<compile_context>
chip_gen: v7x
topology: tpu7x:2x2x1
jax: 0.10.0
libtpu: 0.0.40
codegen_flags: <defaults>
</compile_context>

<pallas_src>
import math
import functools

import jax
import jax.numpy as jnp
from jax.experimental import pallas as pl
from jax.experimental.pallas import tpu as pltpu


def _mab_kernel(xq_ref, xk_ref, wq_ref, bq_ref, wkv_ref, bkv_ref, wo_ref, bo_ref,
                o_ref, h_ref, *, num_heads, tb, nq, nk):
    dim_v = o_ref.shape[-1]
    ds = dim_v // num_heads
    scale = 1.0 / math.sqrt(ds)

    xq = xq_ref[...]                                   # (tb*nq, dim_Q) f32
    xk = xk_ref[...]                                   # (tb*nk, dim_K) f32

    # Projections: bf16 MXU inputs, f32 accumulation.  fc_k / fc_v are fused.
    q2 = jnp.dot(xq.astype(jnp.bfloat16), wq_ref[...],
                 preferred_element_type=jnp.float32) + bq_ref[...]     # (tb*nq, dim_v)
    kv = jnp.dot(xk.astype(jnp.bfloat16), wkv_ref[...],
                 preferred_element_type=jnp.float32) + bkv_ref[...]    # (tb*nk, 2*dim_v)

    q = q2.reshape(tb, nq, dim_v)
    k = kv[:, :dim_v].reshape(tb, nk, dim_v)
    v = kv[:, dim_v:].reshape(tb, nk, dim_v)

    # NOTE: for very large set sizes the (nq, nk) logits should additionally be
    # tiled with an online-softmax (flash-style) key loop to bound VMEM (v7x
    # only has 64 MiB physical); here the logits comfortably fit.
    for h in range(num_heads):                         # static unroll over heads
        sl = slice(h * ds, (h + 1) * ds)
        qh = q[..., sl]                                # (tb, nq, ds) f32
        kh = k[..., sl]
        vh = v[..., sl]
        # Q·K^T without materializing a transpose: contract last-vs-last.
        dots = jnp.einsum("bnd,bmd->bnm",
                          (qh * scale).astype(jnp.bfloat16),
                          kh.astype(jnp.bfloat16),
                          preferred_element_type=jnp.float32)          # (tb, nq, nk)
        m = jnp.max(dots, axis=-1, keepdims=True)
        e = jnp.exp(dots - m)
        a = e * pl.reciprocal(jnp.sum(e, axis=-1, keepdims=True), approx=True)
        av = jnp.einsum("bnm,bmd->bnd",
                        a.astype(jnp.bfloat16), vh.astype(jnp.bfloat16),
                        preferred_element_type=jnp.float32)            # (tb, nq, ds)
        # Per-head residual written straight into the scratch slab (no concat).
        h_ref[:, sl] = (qh + av).reshape(tb * nq, ds)

    hmat = h_ref[...]                                  # (tb*nq, dim_v) f32
    o = jnp.dot(hmat.astype(jnp.bfloat16), wo_ref[...],
                preferred_element_type=jnp.float32) + bo_ref[...]
    o_ref[...] = (hmat + jnp.maximum(o, 0.0)).astype(o_ref.dtype)


def _choose_tb(batch, nq, nk):
    """Batch elements per grid step: big enough to amortize per-step overhead,
    rows a multiple of 8 (tiling), and >= 2 grid steps when possible (v7x)."""
    target = max(1, 512 // max(nq, 1))
    cands = [t for t in range(min(batch, target), 0, -1)
             if batch % t == 0 and (t * nq) % 8 == 0 and (t * nk) % 8 == 0]
    if not cands:
        return batch                       # single full-array block (always legal)
    tb = cands[0]
    if batch // tb < 2 and batch > 1:
        multi = [t for t in cands if batch // t >= 2]
        if multi:
            tb = multi[0]
    return tb


def mab_forward(xq, xk, params, num_heads, tb=None):
    B, nq, dim_q = xq.shape
    bk_, nk, dim_k = xk.shape
    assert B == bk_
    dim_v = params["wq"].shape[1]
    assert dim_v % num_heads == 0

    if tb is None:
        tb = _choose_tb(B, nq, nk)
    assert B % tb == 0

    # Fused K/V projection weight; weights pre-cast to bf16 (halves weight DMA).
    w_kv = jnp.concatenate([params["wk"], params["wv"]], axis=1).astype(jnp.bfloat16)
    b_kv = jnp.concatenate([params["bk"], params["bv"]], axis=1)          # f32
    w_q = params["wq"].astype(jnp.bfloat16)
    w_o = params["wo"].astype(jnp.bfloat16)

    rows_q, rows_k = tb * nq, tb * nk
    kernel = functools.partial(_mab_kernel, num_heads=num_heads, tb=tb, nq=nq, nk=nk)

    out2d = pl.pallas_call(
        kernel,
        out_shape=jax.ShapeDtypeStruct((B * nq, dim_v), xq.dtype),
        grid_spec=pltpu.PrefetchScalarGridSpec(
            num_scalar_prefetch=0,
            grid=(B // tb,),
            in_specs=[
                pl.BlockSpec((rows_q, dim_q), lambda b: (b, 0)),      # Xq rows
                pl.BlockSpec((rows_k, dim_k), lambda b: (b, 0)),      # Xk rows
                # Weight specs are grid-invariant: Pallas DMAs them only once
                # (block index never changes).  For very large dims they should
                # instead be tiled over extra grid axes / single-buffered.
                pl.BlockSpec((dim_q, dim_v), lambda b: (0, 0)),       # Wq  (bf16)
                pl.BlockSpec((1, dim_v), lambda b: (0, 0)),           # bq
                pl.BlockSpec((dim_k, 2 * dim_v), lambda b: (0, 0)),   # [Wk|Wv] (bf16)
                pl.BlockSpec((1, 2 * dim_v), lambda b: (0, 0)),       # [bk|bv]
                pl.BlockSpec((dim_v, dim_v), lambda b: (0, 0)),       # Wo  (bf16)
                pl.BlockSpec((1, dim_v), lambda b: (0, 0)),           # bo
            ],
            out_specs=pl.BlockSpec((rows_q, dim_v), lambda b: (b, 0)),
            scratch_shapes=[pltpu.VMEM((rows_q, dim_v), jnp.float32)],
        ),
        compiler_params=pltpu.CompilerParams(
            dimension_semantics=("parallel",),
            vmem_limit_bytes=48 * 1024 * 1024,
        ),
    )(xq.reshape(B * nq, dim_q), xk.reshape(B * nk, dim_k),
      w_q, params["bq"], w_kv, b_kv, w_o, params["bo"])
    return out2d.reshape(B, nq, dim_v)


def mab_reference(xq, xk, params, num_heads):
    # Pure-JAX f32 mirror of the PyTorch MAB forward (no mask, ln=False).
    q = xq @ params["wq"] + params["bq"][0]
    k = xk @ params["wk"] + params["bk"][0]
    v = xk @ params["wv"] + params["bv"][0]
    dim_v = q.shape[-1]
    ds = dim_v // num_heads
    qh = jnp.concatenate(jnp.split(q, num_heads, axis=2), axis=0)   # (H*B, Nq, ds)
    kh = jnp.concatenate(jnp.split(k, num_heads, axis=2), axis=0)
    vh = jnp.concatenate(jnp.split(v, num_heads, axis=2), axis=0)
    a = jax.nn.softmax(jnp.einsum("bnd,bmd->bnm", qh, kh) / math.sqrt(ds), axis=2)
    h = qh + jnp.einsum("bnm,bmd->bnd", a, vh)
    h = jnp.concatenate(jnp.split(h, num_heads, axis=0), axis=2)    # (B, Nq, dim_v)
    return h + jax.nn.relu(h @ params["wo"] + params["bo"][0])


def init_params(key, dim_q, dim_k, dim_v):
    # Deterministic init mimicking nn.Linear default (uniform +/- 1/sqrt(fan_in)).
    def linear(k, fan_in, fan_out):
        k1, k2 = jax.random.split(k)
        bound = 1.0 / math.sqrt(fan_in)
        w = jax.random.uniform(k1, (fan_in, fan_out), jnp.float32, -bound, bound)
        b = jax.random.uniform(k2, (1, fan_out), jnp.float32, -bound, bound)
        return w, b

    kq, kk, kv, ko = jax.random.split(key, 4)
    wq, bq = linear(kq, dim_q, dim_v)
    wk, bk = linear(kk, dim_k, dim_v)
    wv, bv = linear(kv, dim_k, dim_v)
    wo, bo = linear(ko, dim_v, dim_v)
    return dict(wq=wq, bq=bq, wk=wk, bk=bk, wv=wv, bv=bv, wo=wo, bo=bo)


if __name__ == "__main__":
    num_heads = 4
    B, nq, nk = 2, 8, 16
    dim_q, dim_k, dim_v = 32, 48, 32

    key = jax.random.PRNGKey(0)
    kq, kk, kp, kp2 = jax.random.split(key, 4)
    xq = jax.random.normal(kq, (B, nq, dim_q), jnp.float32)
    xk = jax.random.normal(kk, (B, nk, dim_k), jnp.float32)
    params = init_params(kp, dim_q, dim_k, dim_v)

    # General MAB(Q, K) with distinct operands / set sizes / feature dims.
    out = jax.block_until_ready(mab_forward(xq, xk, params, num_heads))
    ref = mab_reference(xq, xk, params, num_heads)
    assert out.shape == (B, nq, dim_v)
    # bf16 MXU inputs + approx reciprocal -> loosened tolerance vs f32 reference.
    assert jnp.allclose(out, ref, atol=5e-2, rtol=5e-2), (
        "MAB mismatch, max abs err = %g" % float(jnp.max(jnp.abs(out - ref))))

    # Self-attention usage (SAB = MAB(X, X)), matching the previous kernel.
    x = jax.random.normal(kq, (B, nq, dim_q), jnp.float32)
    params_sab = init_params(kp2, dim_q, dim_q, dim_v)
    out2 = jax.block_until_ready(mab_forward(x, x, params_sab, num_heads))
    ref2 = mab_reference(x, x, params_sab, num_heads)
    assert jnp.allclose(out2, ref2, atol=5e-2, rtol=5e-2), (
        "SAB mismatch, max abs err = %g" % float(jnp.max(jnp.abs(out2 - ref2))))

    print("KERNEL_OK")
</pallas_src>

<mosaic_0001>
module attributes {stable_mosaic.version = 11 : i64} {
  func.func @_mab_kernel(%arg0: i32, %arg1: memref<8x32xf32, #tpu.memory_space<vmem>>, %arg2: memref<16x48xf32, #tpu.memory_space<vmem>>, %arg3: memref<32x32xbf16, #tpu.memory_space<vmem>>, %arg4: memref<1x32xf32, #tpu.memory_space<vmem>>, %arg5: memref<48x64xbf16, #tpu.memory_space<vmem>>, %arg6: memref<1x64xf32, #tpu.memory_space<vmem>>, %arg7: memref<32x32xbf16, #tpu.memory_space<vmem>>, %arg8: memref<1x32xf32, #tpu.memory_space<vmem>>, %arg9: memref<8x32xf32, #tpu.memory_space<vmem>>, %arg10: memref<8x32xf32, #tpu.memory_space<vmem>>) attributes {dimension_semantics = [#tpu.dimension_semantics<parallel>], iteration_bounds = array<i64: 2>, scalar_prefetch = 0 : i64, scratch_operands = 1 : i64, tpu.core_type = #tpu.core_type<tc>, window_params = [{transform_indices = @transform_0, window_bounds = array<i64: 8, 32>}, {transform_indices = @transform_1, window_bounds = array<i64: 16, 48>}, {pipeline_mode = #tpu.pipeline_mode<synchronous>, transform_indices = @transform_2, window_bounds = array<i64: 32, 32>}, {pipeline_mode = #tpu.pipeline_mode<synchronous>, transform_indices = @transform_3, window_bounds = array<i64: 1, 32>}, {pipeline_mode = #tpu.pipeline_mode<synchronous>, transform_indices = @transform_4, window_bounds = array<i64: 48, 64>}, {pipeline_mode = #tpu.pipeline_mode<synchronous>, transform_indices = @transform_5, window_bounds = array<i64: 1, 64>}, {pipeline_mode = #tpu.pipeline_mode<synchronous>, transform_indices = @transform_6, window_bounds = array<i64: 32, 32>}, {pipeline_mode = #tpu.pipeline_mode<synchronous>, transform_indices = @transform_7, window_bounds = array<i64: 1, 32>}, {transform_indices = @transform_8, window_bounds = array<i64: 8, 32>}]} {
    %c0 = arith.constant 0 : index
    %c0_0 = arith.constant 0 : index
    %0 = vector.load %arg1[%c0, %c0_0] : memref<8x32xf32, #tpu.memory_space<vmem>>, vector<8x32xf32>
    %c0_1 = arith.constant 0 : index
    %c0_2 = arith.constant 0 : index
    %1 = vector.load %arg2[%c0_1, %c0_2] : memref<16x48xf32, #tpu.memory_space<vmem>>, vector<16x48xf32>
    %2 = arith.truncf %0 : vector<8x32xf32> to vector<8x32xbf16>
    %c0_3 = arith.constant 0 : index
    %c0_4 = arith.constant 0 : index
    %3 = vector.load %arg3[%c0_3, %c0_4] : memref<32x32xbf16, #tpu.memory_space<vmem>>, vector<32x32xbf16>
    %cst = arith.constant dense<0.000000e+00> : vector<8x32xf32>
    %4 = tpu.matmul %2, %3, %cst {dimension_numbers = #tpu.dot_dimension_numbers<[1], [0], [0], [1], [0, 0, 1, 1], [], []>} : vector<8x32xbf16>, vector<32x32xbf16>, vector<8x32xf32> -> vector<8x32xf32>
    %c0_5 = arith.constant 0 : index
    %c0_6 = arith.constant 0 : index
    %5 = vector.load %arg4[%c0_5, %c0_6] : memref<1x32xf32, #tpu.memory_space<vmem>>, vector<1x32xf32>
    %6 = vector.broadcast %5 : vector<1x32xf32> to vector<8x32xf32>
    %7 = arith.addf %4, %6 : vector<8x32xf32>
    %8 = arith.truncf %1 : vector<16x48xf32> to vector<16x48xbf16>
    %c0_7 = arith.constant 0 : index
    %c0_8 = arith.constant 0 : index
    %9 = vector.load %arg5[%c0_7, %c0_8] : memref<48x64xbf16, #tpu.memory_space<vmem>>, vector<48x64xbf16>
    %cst_9 = arith.constant dense<0.000000e+00> : vector<16x64xf32>
    %10 = tpu.matmul %8, %9, %cst_9 {dimension_numbers = #tpu.dot_dimension_numbers<[1], [0], [0], [1], [0, 0, 1, 1], [], []>} : vector<16x48xbf16>, vector<48x64xbf16>, vector<16x64xf32> -> vector<16x64xf32>
    %c0_10 = arith.constant 0 : index
    %c0_11 = arith.constant 0 : index
    %11 = vector.load %arg6[%c0_10, %c0_11] : memref<1x64xf32, #tpu.memory_space<vmem>>, vector<1x64xf32>
    %12 = vector.broadcast %11 : vector<1x64xf32> to vector<16x64xf32>
    %13 = arith.addf %10, %12 : vector<16x64xf32>
    %14 = vector.shape_cast %7 : vector<8x32xf32> to vector<1x8x32xf32>
    %15 = vector.extract_strided_slice %13 {offsets = [0, 0], sizes = [16, 32], strides = [1, 1]} : vector<16x64xf32> to vector<16x32xf32>
    %16 = vector.shape_cast %15 : vector<16x32xf32> to vector<1x16x32xf32>
    %17 = vector.extract_strided_slice %13 {offsets = [0, 32], sizes = [16, 32], strides = [1, 1]} : vector<16x64xf32> to vector<16x32xf32>
    %18 = vector.shape_cast %17 : vector<16x32xf32> to vector<1x16x32xf32>
    %19 = vector.extract_strided_slice %14 {offsets = [0, 0, 0], sizes = [1, 8, 8], strides = [1, 1, 1]} : vector<1x8x32xf32> to vector<1x8x8xf32>
    %20 = vector.extract_strided_slice %16 {offsets = [0, 0, 0], sizes = [1, 16, 8], strides = [1, 1, 1]} : vector<1x16x32xf32> to vector<1x16x8xf32>
    %21 = vector.extract_strided_slice %18 {offsets = [0, 0, 0], sizes = [1, 16, 8], strides = [1, 1, 1]} : vector<1x16x32xf32> to vector<1x16x8xf32>
    %cst_12 = arith.constant 0.353553385 : f32
    %22 = vector.broadcast %cst_12 : f32 to vector<1x8x8xf32>
    %23 = arith.mulf %19, %22 : vector<1x8x8xf32>
    %24 = arith.truncf %23 : vector<1x8x8xf32> to vector<1x8x8xbf16>
    %25 = arith.truncf %20 : vector<1x16x8xf32> to vector<1x16x8xbf16>
    "tpu.trace_start"() <{level = 10 : i32, message = "bnd,bmd->bnm"}> : () -> ()
    %cst_13 = arith.constant dense<0.000000e+00> : vector<1x8x16xf32>
    %26 = tpu.matmul %24, %25, %cst_13 {dimension_numbers = #tpu.dot_dimension_numbers<[2], [2], [1], [1], [0, 0, 0, 1, 1, 1], [0], [0]>} : vector<1x8x8xbf16>, vector<1x16x8xbf16>, vector<1x8x16xf32> -> vector<1x8x16xf32>
    "tpu.trace_stop"() : () -> ()
    %cst_14 = arith.constant dense<0xFF800000> : vector<1x8xf32>
    %27 = vector.multi_reduction <maximumf>, %26, %cst_14 [2] : vector<1x8x16xf32> to vector<1x8xf32>
    %28 = vector.shape_cast %27 : vector<1x8xf32> to vector<1x8x1xf32>
    %29 = vector.broadcast %28 : vector<1x8x1xf32> to vector<1x8x16xf32>
    %30 = arith.subf %26, %29 : vector<1x8x16xf32>
    %31 = math.exp %30 : vector<1x8x16xf32>
    %cst_15 = arith.constant dense<0.000000e+00> : vector<1x8xf32>
    %32 = vector.multi_reduction <add>, %31, %cst_15 [2] : vector<1x8x16xf32> to vector<1x8xf32>
    %33 = vector.shape_cast %32 : vector<1x8xf32> to vector<1x8x1xf32>
    %34 = tpu.reciprocal %33 {approx = true} : vector<1x8x1xf32> -> vector<1x8x1xf32>
    %35 = vector.broadcast %34 : vector<1x8x1xf32> to vector<1x8x16xf32>
    %36 = arith.mulf %31, %35 : vector<1x8x16xf32>
    %37 = arith.truncf %36 : vector<1x8x16xf32> to vector<1x8x16xbf16>
    %38 = arith.truncf %21 : vector<1x16x8xf32> to vector<1x16x8xbf16>
    "tpu.trace_start"() <{level = 10 : i32, message = "bnm,bmd->bnd"}> : () -> ()
    %cst_16 = arith.constant dense<0.000000e+00> : vector<1x8x8xf32>
    %39 = tpu.matmul %37, %38, %cst_16 {dimension_numbers = #tpu.dot_dimension_numbers<[2], [1], [1], [2], [0, 0, 0, 1, 1, 2], [0], [0]>} : vector<1x8x16xbf16>, vector<1x16x8xbf16>, vector<1x8x8xf32> -> vector<1x8x8xf32>
    "tpu.trace_stop"() : () -> ()
    %40 = arith.addf %19, %39 : vector<1x8x8xf32>
    %41 = vector.shape_cast %40 : vector<1x8x8xf32> to vector<8x8xf32>
    %c0_17 = arith.constant 0 : index
    %c0_18 = arith.constant 0 : index
    %42 = vector.load %arg10[%c0_17, %c0_18] : memref<8x32xf32, #tpu.memory_space<vmem>>, vector<8x8xf32>
    tpu.vector_store %arg10[%c0_17, %c0_18], %41 {strides = array<i32>} : memref<8x32xf32, #tpu.memory_space<vmem>>, vector<8x8xf32>,
    %43 = vector.extract_strided_slice %14 {offsets = [0, 0, 8], sizes = [1, 8, 8], strides = [1, 1, 1]} : vector<1x8x32xf32> to vector<1x8x8xf32>
    %44 = vector.extract_strided_slice %16 {offsets = [0, 0, 8], sizes = [1, 16, 8], strides = [1, 1, 1]} : vector<1x16x32xf32> to vector<1x16x8xf32>
    %45 = vector.extract_strided_slice %18 {offsets = [0, 0, 8], sizes = [1, 16, 8], strides = [1, 1, 1]} : vector<1x16x32xf32> to vector<1x16x8xf32>
    %cst_19 = arith.constant 0.353553385 : f32
    %46 = vector.broadcast %cst_19 : f32 to vector<1x8x8xf32>
    %47 = arith.mulf %43, %46 : vector<1x8x8xf32>
    %48 = arith.truncf %47 : vector<1x8x8xf32> to vector<1x8x8xbf16>
    %49 = arith.truncf %44 : vector<1x16x8xf32> to vector<1x16x8xbf16>
    "tpu.trace_start"() <{level = 10 : i32, message = "bnd,bmd->bnm"}> : () -> ()
    %cst_20 = arith.constant dense<0.000000e+00> : vector<1x8x16xf32>
    %50 = tpu.matmul %48, %49, %cst_20 {dimension_numbers = #tpu.dot_dimension_numbers<[2], [2], [1], [1], [0, 0, 0, 1, 1, 1], [0], [0]>} : vector<1x8x8xbf16>, vector<1x16x8xbf16>, vector<1x8x16xf32> -> vector<1x8x16xf32>
    "tpu.trace_stop"() : () -> ()
    %cst_21 = arith.constant dense<0xFF800000> : vector<1x8xf32>
    %51 = vector.multi_reduction <maximumf>, %50, %cst_21 [2] : vector<1x8x16xf32> to vector<1x8xf32>
    %52 = vector.shape_cast %51 : vector<1x8xf32> to vector<1x8x1xf32>
    %53 = vector.broadcast %52 : vector<1x8x1xf32> to vector<1x8x16xf32>
    %54 = arith.subf %50, %53 : vector<1x8x16xf32>
    %55 = math.exp %54 : vector<1x8x16xf32>
    %cst_22 = arith.constant dense<0.000000e+00> : vector<1x8xf32>
    %56 = vector.multi_reduction <add>, %55, %cst_22 [2] : vector<1x8x16xf32> to vector<1x8xf32>
    %57 = vector.shape_cast %56 : vector<1x8xf32> to vector<1x8x1xf32>
    %58 = tpu.reciprocal %57 {approx = true} : vector<1x8x1xf32> -> vector<1x8x1xf32>
    %59 = vector.broadcast %58 : vector<1x8x1xf32> to vector<1x8x16xf32>
    %60 = arith.mulf %55, %59 : vector<1x8x16xf32>
    %61 = arith.truncf %60 : vector<1x8x16xf32> to vector<1x8x16xbf16>
    %62 = arith.truncf %45 : vector<1x16x8xf32> to vector<1x16x8xbf16>
    "tpu.trace_start"() <{level = 10 : i32, message = "bnm,bmd->bnd"}> : () -> ()
    %cst_23 = arith.constant dense<0.000000e+00> : vector<1x8x8xf32>
    %63 = tpu.matmul %61, %62, %cst_23 {dimension_numbers = #tpu.dot_dimension_numbers<[2], [1], [1], [2], [0, 0, 0, 1, 1, 2], [0], [0]>} : vector<1x8x16xbf16>, vector<1x16x8xbf16>, vector<1x8x8xf32> -> vector<1x8x8xf32>
    "tpu.trace_stop"() : () -> ()
    %64 = arith.addf %43, %63 : vector<1x8x8xf32>
    %65 = vector.shape_cast %64 : vector<1x8x8xf32> to vector<8x8xf32>
    %c0_24 = arith.constant 0 : index
    %c8 = arith.constant 8 : index
    %66 = vector.load %arg10[%c0_24, %c8] : memref<8x32xf32, #tpu.memory_space<vmem>>, vector<8x8xf32>
    tpu.vector_store %arg10[%c0_24, %c8], %65 {strides = array<i32>} : memref<8x32xf32, #tpu.memory_space<vmem>>, vector<8x8xf32>,
    %67 = vector.extract_strided_slice %14 {offsets = [0, 0, 16], sizes = [1, 8, 8], strides = [1, 1, 1]} : vector<1x8x32xf32> to vector<1x8x8xf32>
    %68 = vector.extract_strided_slice %16 {offsets = [0, 0, 16], sizes = [1, 16, 8], strides = [1, 1, 1]} : vector<1x16x32xf32> to vector<1x16x8xf32>
    %69 = vector.extract_strided_slice %18 {offsets = [0, 0, 16], sizes = [1, 16, 8], strides = [1, 1, 1]} : vector<1x16x32xf32> to vector<1x16x8xf32>
    %cst_25 = arith.constant 0.353553385 : f32
    %70 = vector.broadcast %cst_25 : f32 to vector<1x8x8xf32>
    %71 = arith.mulf %67, %70 : vector<1x8x8xf32>
    %72 = arith.truncf %71 : vector<1x8x8xf32> to vector<1x8x8xbf16>
    %73 = arith.truncf %68 : vector<1x16x8xf32> to vector<1x16x8xbf16>
    "tpu.trace_start"() <{level = 10 : i32, message = "bnd,bmd->bnm"}> : () -> ()
    %cst_26 = arith.constant dense<0.000000e+00> : vector<1x8x16xf32>
    %74 = tpu.matmul %72, %73, %cst_26 {dimension_numbers = #tpu.dot_dimension_numbers<[2], [2], [1], [1], [0, 0, 0, 1, 1, 1], [0], [0]>} : vector<1x8x8xbf16>, vector<1x16x8xbf16>, vector<1x8x16xf32> -> vector<1x8x16xf32>
    "tpu.trace_stop"() : () -> ()
    %cst_27 = arith.constant dense<0xFF800000> : vector<1x8xf32>
    %75 = vector.multi_reduction <maximumf>, %74, %cst_27 [2] : vector<1x8x16xf32> to vector<1x8xf32>
    %76 = vector.shape_cast %75 : vector<1x8xf32> to vector<1x8x1xf32>
    %77 = vector.broadcast %76 : vector<1x8x1xf32> to vector<1x8x16xf32>
    %78 = arith.subf %74, %77 : vector<1x8x16xf32>
    %79 = math.exp %78 : vector<1x8x16xf32>
    %cst_28 = arith.constant dense<0.000000e+00> : vector<1x8xf32>
    %80 = vector.multi_reduction <add>, %79, %cst_28 [2] : vector<1x8x16xf32> to vector<1x8xf32>
    %81 = vector.shape_cast %80 : vector<1x8xf32> to vector<1x8x1xf32>
    %82 = tpu.reciprocal %81 {approx = true} : vector<1x8x1xf32> -> vector<1x8x1xf32>
    %83 = vector.broadcast %82 : vector<1x8x1xf32> to vector<1x8x16xf32>
    %84 = arith.mulf %79, %83 : vector<1x8x16xf32>
    %85 = arith.truncf %84 : vector<1x8x16xf32> to vector<1x8x16xbf16>
    %86 = arith.truncf %69 : vector<1x16x8xf32> to vector<1x16x8xbf16>
    "tpu.trace_start"() <{level = 10 : i32, message = "bnm,bmd->bnd"}> : () -> ()
    %cst_29 = arith.constant dense<0.000000e+00> : vector<1x8x8xf32>
    %87 = tpu.matmul %85, %86, %cst_29 {dimension_numbers = #tpu.dot_dimension_numbers<[2], [1], [1], [2], [0, 0, 0, 1, 1, 2], [0], [0]>} : vector<1x8x16xbf16>, vector<1x16x8xbf16>, vector<1x8x8xf32> -> vector<1x8x8xf32>
    "tpu.trace_stop"() : () -> ()
    %88 = arith.addf %67, %87 : vector<1x8x8xf32>
    %89 = vector.shape_cast %88 : vector<1x8x8xf32> to vector<8x8xf32>
    %c0_30 = arith.constant 0 : index
    %c16 = arith.constant 16 : index
    %90 = vector.load %arg10[%c0_30, %c16] : memref<8x32xf32, #tpu.memory_space<vmem>>, vector<8x8xf32>
    tpu.vector_store %arg10[%c0_30, %c16], %89 {strides = array<i32>} : memref<8x32xf32, #tpu.memory_space<vmem>>, vector<8x8xf32>,
    %91 = vector.extract_strided_slice %14 {offsets = [0, 0, 24], sizes = [1, 8, 8], strides = [1, 1, 1]} : vector<1x8x32xf32> to vector<1x8x8xf32>
    %92 = vector.extract_strided_slice %16 {offsets = [0, 0, 24], sizes = [1, 16, 8], strides = [1, 1, 1]} : vector<1x16x32xf32> to vector<1x16x8xf32>
    %93 = vector.extract_strided_slice %18 {offsets = [0, 0, 24], sizes = [1, 16, 8], strides = [1, 1, 1]} : vector<1x16x32xf32> to vector<1x16x8xf32>
    %cst_31 = arith.constant 0.353553385 : f32
    %94 = vector.broadcast %cst_31 : f32 to vector<1x8x8xf32>
    %95 = arith.mulf %91, %94 : vector<1x8x8xf32>
    %96 = arith.truncf %95 : vector<1x8x8xf32> to vector<1x8x8xbf16>
    %97 = arith.truncf %92 : vector<1x16x8xf32> to vector<1x16x8xbf16>
    "tpu.trace_start"() <{level = 10 : i32, message = "bnd,bmd->bnm"}> : () -> ()
    %cst_32 = arith.constant dense<0.000000e+00> : vector<1x8x16xf32>
    %98 = tpu.matmul %96, %97, %cst_32 {dimension_numbers = #tpu.dot_dimension_numbers<[2], [2], [1], [1], [0, 0, 0, 1, 1, 1], [0], [0]>} : vector<1x8x8xbf16>, vector<1x16x8xbf16>, vector<1x8x16xf32> -> vector<1x8x16xf32>
    "tpu.trace_stop"() : () -> ()
    %cst_33 = arith.constant dense<0xFF800000> : vector<1x8xf32>
    %99 = vector.multi_reduction <maximumf>, %98, %cst_33 [2] : vector<1x8x16xf32> to vector<1x8xf32>
    %100 = vector.shape_cast %99 : vector<1x8xf32> to vector<1x8x1xf32>
    %101 = vector.broadcast %100 : vector<1x8x1xf32> to vector<1x8x16xf32>
    %102 = arith.subf %98, %101 : vector<1x8x16xf32>
    %103 = math.exp %102 : vector<1x8x16xf32>
    %cst_34 = arith.constant dense<0.000000e+00> : vector<1x8xf32>
    %104 = vector.multi_reduction <add>, %103, %cst_34 [2] : vector<1x8x16xf32> to vector<1x8xf32>
    %105 = vector.shape_cast %104 : vector<1x8xf32> to vector<1x8x1xf32>
    %106 = tpu.reciprocal %105 {approx = true} : vector<1x8x1xf32> -> vector<1x8x1xf32>
    %107 = vector.broadcast %106 : vector<1x8x1xf32> to vector<1x8x16xf32>
    %108 = arith.mulf %103, %107 : vector<1x8x16xf32>
    %109 = arith.truncf %108 : vector<1x8x16xf32> to vector<1x8x16xbf16>
    %110 = arith.truncf %93 : vector<1x16x8xf32> to vector<1x16x8xbf16>
    "tpu.trace_start"() <{level = 10 : i32, message = "bnm,bmd->bnd"}> : () -> ()
    %cst_35 = arith.constant dense<0.000000e+00> : vector<1x8x8xf32>
    %111 = tpu.matmul %109, %110, %cst_35 {dimension_numbers = #tpu.dot_dimension_numbers<[2], [1], [1], [2], [0, 0, 0, 1, 1, 2], [0], [0]>} : vector<1x8x16xbf16>, vector<1x16x8xbf16>, vector<1x8x8xf32> -> vector<1x8x8xf32>
    "tpu.trace_stop"() : () -> ()
    %112 = arith.addf %91, %111 : vector<1x8x8xf32>
    %113 = vector.shape_cast %112 : vector<1x8x8xf32> to vector<8x8xf32>
    %c0_36 = arith.constant 0 : index
    %c24 = arith.constant 24 : index
    %114 = vector.load %arg10[%c0_36, %c24] : memref<8x32xf32, #tpu.memory_space<vmem>>, vector<8x8xf32>
    tpu.vector_store %arg10[%c0_36, %c24], %113 {strides = array<i32>} : memref<8x32xf32, #tpu.memory_space<vmem>>, vector<8x8xf32>,
    %c0_37 = arith.constant 0 : index
    %c0_38 = arith.constant 0 : index
    %115 = vector.load %arg10[%c0_37, %c0_38] : memref<8x32xf32, #tpu.memory_space<vmem>>, vector<8x32xf32>
    %116 = arith.truncf %115 : vector<8x32xf32> to vector<8x32xbf16>
    %c0_39 = arith.constant 0 : index
    %c0_40 = arith.constant 0 : index
    %117 = vector.load %arg7[%c0_39, %c0_40] : memref<32x32xbf16, #tpu.memory_space<vmem>>, vector<32x32xbf16>
    %cst_41 = arith.constant dense<0.000000e+00> : vector<8x32xf32>
    %118 = tpu.matmul %116, %117, %cst_41 {dimension_numbers = #tpu.dot_dimension_numbers<[1], [0], [0], [1], [0, 0, 1, 1], [], []>} : vector<8x32xbf16>, vector<32x32xbf16>, vector<8x32xf32> -> vector<8x32xf32>
    %c0_42 = arith.constant 0 : index
    %c0_43 = arith.constant 0 : index
    %119 = vector.load %arg8[%c0_42, %c0_43] : memref<1x32xf32, #tpu.memory_space<vmem>>, vector<1x32xf32>
    %120 = vector.broadcast %119 : vector<1x32xf32> to vector<8x32xf32>
    %121 = arith.addf %118, %120 : vector<8x32xf32>
    %cst_44 = arith.constant 0.000000e+00 : f32
    %122 = vector.broadcast %cst_44 : f32 to vector<8x32xf32>
    %123 = arith.maximumf %121, %122 : vector<8x32xf32>
    %124 = arith.addf %115, %123 : vector<8x32xf32>
    %c0_45 = arith.constant 0 : index
    %c0_46 = arith.constant 0 : index
    %125 = vector.load %arg9[%c0_45, %c0_46] : memref<8x32xf32, #tpu.memory_space<vmem>>, vector<8x32xf32>
    tpu.vector_store %arg9[%c0_45, %c0_46], %124 {strides = array<i32>} : memref<8x32xf32, #tpu.memory_space<vmem>>, vector<8x32xf32>,
    return
  }
  func.func @transform_0(%arg0: i32) -> (i32, i32) {
    %c0_i32 = arith.constant 0 : i32
    %c0_i32_0 = arith.constant 0 : i32
    return %arg0, %c0_i32 : i32, i32
  }
  func.func @transform_1(%arg0: i32) -> (i32, i32) {
    %c0_i32 = arith.constant 0 : i32
    %c0_i32_0 = arith.constant 0 : i32
    return %arg0, %c0_i32 : i32, i32
  }
  func.func @transform_2(%arg0: i32) -> (i32, i32) {
    %c0_i32 = arith.constant 0 : i32
    %c0_i32_0 = arith.constant 0 : i32
    %c0_i32_1 = arith.constant 0 : i32
    return %c0_i32, %c0_i32_0 : i32, i32
  }
  func.func @transform_3(%arg0: i32) -> (i32, i32) {
    %c0_i32 = arith.constant 0 : i32
    %c0_i32_0 = arith.constant 0 : i32
    %c0_i32_1 = arith.constant 0 : i32
    return %c0_i32, %c0_i32_0 : i32, i32
  }
  func.func @transform_4(%arg0: i32) -> (i32, i32) {
    %c0_i32 = arith.constant 0 : i32
    %c0_i32_0 = arith.constant 0 : i32
    %c0_i32_1 = arith.constant 0 : i32
    return %c0_i32, %c0_i32_0 : i32, i32
  }
  func.func @transform_5(%arg0: i32) -> (i32, i32) {
    %c0_i32 = arith.constant 0 : i32
    %c0_i32_0 = arith.constant 0 : i32
    %c0_i32_1 = arith.constant 0 : i32
    return %c0_i32, %c0_i32_0 : i32, i32
  }
  func.func @transform_6(%arg0: i32) -> (i32, i32) {
    %c0_i32 = arith.constant 0 : i32
    %c0_i32_0 = arith.constant 0 : i32
    %c0_i32_1 = arith.constant 0 : i32
    return %c0_i32, %c0_i32_0 : i32, i32
  }
  func.func @transform_7(%arg0: i32) -> (i32, i32) {
    %c0_i32 = arith.constant 0 : i32
    %c0_i32_0 = arith.constant 0 : i32
    %c0_i32_1 = arith.constant 0 : i32
    return %c0_i32, %c0_i32_0 : i32, i32
  }
  func.func @transform_8(%arg0: i32) -> (i32, i32) {
    %c0_i32 = arith.constant 0 : i32
    %c0_i32_0 = arith.constant 0 : i32
    return %arg0, %c0_i32 : i32, i32
  }
}

</mosaic_0001>

<bundles_post_ra>
// kernel: tpu_custom_call.1
= control target key start
LH: loop header
LB: loop body
LE: loop exit
PB: predicated region body
PF: predicated region fallthrough
CT: control target
= control target key end

     0   :  { %s2090_s0 = inlined_call_operand.hbm [shape: f32[16,32], index: 0, kind: input, shape index: {}]   ;;  %s2091_s1 = inlined_call_operand.hbm [shape: f32[32,48], index: 1, kind: input, shape index: {}]   ;;  %s2092_s2 = inlined_call_operand.hbm [shape: bf16[32,32], index: 2, kind: input, shape index: {}]   ;;  %s2093_s3 = inlined_call_operand.vmem [shape: f32[1,32], index: 3, kind: input, shape index: {}]   ;;  %s2094_s4 = inlined_call_operand.hbm [shape: bf16[48,64], index: 4, kind: input, shape index: {}]   ;;  %s2095_s5 = inlined_call_operand.vmem [shape: f32[1,64], index: 5, kind: input, shape index: {}]   ;;  %s2096_s6 = inlined_call_operand.vmem [shape: bf16[32,32], index: 6, kind: input, shape index: {}]   ;;  %s2097_s7 = inlined_call_operand.vmem [shape: f32[1,32], index: 7, kind: input, shape index: {}]   ;;  %s2098_s8 = inlined_call_operand.hbm [shape: f32[16,32], index: 8, kind: output, shape index: {}]  }
   0x1   :  { %2102 = sst [smem:[#allocation18_spill]] %s2090_s0 }
   0x2   :  { %2103 = sst [smem:[#allocation19_spill]] %s2092_s2 }
   0x3   :  { %2104 = sst [smem:[#allocation20_spill]] %s2094_s4 }
   0x4   :  { %13 = vsyncpa [#allocation4], 0 }
   0x5   :  { %15 = vsyncpa [#allocation4 + $0x1], 0 }
   0x6   :  { %16 = vsyncpa [#allocation7], 0 }
   0x7   :  { %18 = vsyncpa [#allocation7 + $0x1], 0 }
   0x8   :  { %19 = vsyncpa [#allocation10], 0 }
   0x9   :  { %20 = vsyncpa [#allocation5], 0 }
   0xa   :  { %22 = vsyncpa [#allocation5 + $0x1], 0  ;;  %s1710_s27 = smov 0   ;;  %s1712_s28 = smov 0  }
   0xb   :  { %s1714_s29 = smov 0   ;;  %s1716_s30 = smov 0  }
   0xc LB: > { %s1731_s9 = sadd.s32 4294967295, %s1642_s30   ;;  %s1195_s10 = sadd.s32 4294967294, %s1642_s30   ;;  %s1642_s30 = sphi %s1716_s30, %s2129_s30   ;;  %s1638_s29 = sphi %s1714_s29, %s2128_s29   ;;  %s1634_s28 = sphi %s1712_s28, %s2127_s28   ;;  %s1630_s27 = sphi %s1710_s27, %s2126_s27  }
   0xd   : > { %p48_p0 = scmp.ne.s32.totalorder %s1634_s28, %s1630_s27  ;;  %p2099_p1 = scmp.eq.s32.totalorder %s1731_s9, 0 }
   0xe   : > { %p230_p3 = scmp.eq.s32.totalorder %s1195_s10, 1  ;;  %p1196_p5 = scmp.ge.s32.totalorder %s1642_s30, 1 }
   0xf   : > { %p1740_p4 = por %p2099_p1, %p48_p0  ;;  %p237_p7 = scmp.lt.s32.totalorder %s1642_s30, 3 }
  0x10   : > { %p1745_p6 = por %p230_p3, %p48_p0  ;;  %s1644_s14 = smov [#allocation8]  }
  0x11   : > { %s2105_s11 = scalar_select %p1740_p4, 1, 0 }
  0x12   : > { %s2106_s12 = scalar_select %p1745_p6, 1, 0 }
  0x13   : > { %p1750_p8 = pnand %p1196_p5, %p237_p7  ;;  %s249_s15 = sshll.u32 %s1644_s14, 4  ;;  %s1754_s15 = int_to_ptr.vmem [resolvable:$true] %s249_s15 }
  0x14   : > { %s1645_s17 = smov [#allocation9]   ;;  %s2109_s2 = sld [smem:[#allocation19_spill]] }
  0x15   : > { %p1351_p9 = pneg %p1750_p8  ;;  %s265_s18 = sshll.u32 %s1645_s17, 4  ;;  %s1765_s18 = int_to_ptr.vmem [resolvable:$true] %s265_s18 }
  0x17   : > { %p1761_p11 = pnand %p1351_p9, %p2099_p1 }
  0x19   : > { %p1450_p13 = pneg %p1761_p11 }
  0x1a   : > { %s1448_s21 = scalar_lea.hbm %s2109_s2, 256 }
  0x1b   : > { %p1449_p12 = scmp.ne.s32.totalorder %s2109_s2, %s1448_s21  ;;  %p1455_p5 = scmp.lt.u32.totalorder %s1448_s21, %s2109_s2 }
  0x1d   : > { %p1451_p0 = pnand %p1450_p13, %p1449_p12 }
  0x1f   : > { %p1452_p3 = pneg %p1451_p0 }
  0x21   : > { %p1457_p7 = pnand %p1455_p5, %p1452_p3 }
  0x23   : > { %1460 = shalt.err (!%p1457_p7)
}
  0x24   : > { %s1461_s26 = scalar_lea.vmem %s1754_s15, 256  ;;  %p1469_p2 = scmp.lt.s32.totalorder %s1754_s15, %s1754_s15 }
  0x25   : > { %p1462_p9 = scmp.ne.s32.totalorder %s1754_s15, %s1461_s26  ;;  %p1470_p12 = scmp.lt.s32.totalorder %s1461_s26, %s1461_s26 }
  0x27   : > { %p1464_p10 = pnand %p1462_p9, %p1450_p13  ;;  %p1471_p0 = por %p1470_p12, %p1469_p2 }
  0x29   : > { %p1465_p1 = pneg %p1464_p10 }
  0x2b   : > { %p1472_p6 = pnand %p1471_p0, %p1465_p1 }
  0x2d   : > { %1475 = shalt.err (!%p1472_p6)
}
  0x2e   : > { %s1646_s10 = smov 64   ;;  %s1647_s14 = smov 4  }
  0x2f   : > { %1354 = dma.hbm_to_vmem [thread:$0]  (!%p1761_p11), %s2109_s2, 256, %s1754_s15, [#allocation7], %s1646_s10, %s1646_s10, %s1647_s14  }
  0x30   : > { %s2110_s4 = sld [smem:[#allocation20_spill]] }
  0x36   : > { %s1476_s22 = scalar_lea.hbm %s2110_s4, 384 }
  0x37   : > { %p1477_p2 = scmp.ne.s32.totalorder %s2110_s4, %s1476_s22  ;;  %p1483_p10 = scmp.lt.u32.totalorder %s1476_s22, %s2110_s4 }
  0x39   : > { %p1479_p1 = pnand %p1477_p2, %p1450_p13 }
  0x3b   : > { %p1480_p6 = pneg %p1479_p1 }
  0x3d   : > { %p1485_p3 = pnand %p1483_p10, %p1480_p6 }
  0x3f   : > { %1488 = shalt.err (!%p1485_p3)
}
  0x40   : > { %s1489_s15 = scalar_lea.vmem %s1765_s18, 384  ;;  %p1497_p12 = scmp.lt.s32.totalorder %s1765_s18, %s1765_s18 }
  0x41   : > { %p1490_p5 = scmp.ne.s32.totalorder %s1765_s18, %s1489_s15  ;;  %p1498_p0 = scmp.lt.s32.totalorder %s1489_s15, %s1489_s15 }
  0x43   : > { %p1492_p7 = pnand %p1490_p5, %p1450_p13  ;;  %p1499_p2 = por %p1498_p0, %p1497_p12 }
  0x45   : > { %p1493_p9 = pneg %p1492_p7 }
  0x47   : > { %p1500_p1 = pnand %p1499_p2, %p1493_p9 }
  0x49   : > { %1503 = shalt.err (!%p1500_p1)
}
  0x4a   : > { %1357 = dma.hbm_to_vmem [thread:$0]  (!%p1761_p11), %s2110_s4, 384, %s1765_s18, [#allocation10], %s1646_s10, %s1646_s10, %s1647_s14  }
  0x4b   : > { %s1820_s20 = sadd.s32 1, %s1642_s30   ;;  %s35_s16 = sadd.s32 1, %s1638_s29 }
  0x4c   : > { %s32_s21 = ssub.s32 %s1642_s30, %s1820_s20  ;;  %p42_p13 = scmp.ne.s32.totalorder %s1638_s29, %s1634_s28 }
  0x4d   : > { %p33_p6 = scmp.eq.s32.totalorder %s32_s21, 0  ;;  %p43_p10 = scmp.eq.s32.totalorder %s1642_s30, 0 }
  0x4e   : > { %p2111_p3 = scmp.eq.s32.totalorder %s1731_s9, 1  ;;  %p1371_p7 = scmp.lt.s32.totalorder %s1642_s30, 2 }
  0x4f   : > { %s1836_s23 = scalar_select %p33_p6, %s1638_s29, %s35_s16  }
  0x50   : > { %p1830_p5 = por %p2111_p3, %p42_p13  ;;  %p44_p9 = por %p43_p10, %p42_p13 }
  0x51   : > { %2113 = sst [smem:[#allocation17_spill]] %s1836_s23  ;;  %s1839_s24 = sand.u32 1, %s1638_s29  }
  0x52   : > { %s2112_s22 = scalar_select %p1830_p5, 1, 0 }
  0x53   : > { %s1200_s18 = sshll.u32 %s1839_s24, 3  ;;  %s1201_s10 = sshll.u32 %s1642_s30, 7 }
  0x54   : > { %s2114_s0 = sld [smem:[#allocation18_spill]]  ;;  %s292_s15 = scalar_lea.vmem [#allocation3], %s1200_s18 }
  0x55   : > { %s299_s17 = sshll.u32 %s292_s15, 4  ;;  %p1850_p11 = pnand %p1371_p7, %p44_p9  ;;  %s1848_s17 = int_to_ptr.vmem [resolvable:$true] %s299_s17 }
  0x56   : > { %s1202_s16 = sshll.u32 %s1839_s24, 4  ;;  %s289_s2 = scalar_lea.sflag [#allocation4], %s1839_s24 }
  0x57   : > { %p1506_p0 = pneg %p1850_p11 }
  0x5a   : > { %s1846_s26 = scalar_lea.hbm %s2114_s0, %s1201_s10  ;;  %s1509_s25 = scalar_lea.hbm %s2114_s0, 256 }
  0x5b   : > { %s1504_s14 = scalar_lea.hbm %s1846_s26, 128  ;;  %p1510_p13 = scmp.lt.u32.totalorder %s1846_s26, %s2114_s0 }
  0x5c   : > { %p1505_p12 = scmp.ne.s32.totalorder %s1846_s26, %s1504_s14  ;;  %p1511_p6 = scmp.lt.u32.totalorder %s1509_s25, %s1504_s14 }
  0x5d   : > { %p1513_p3 = scmp.lt.u32.totalorder %s1504_s14, %s1846_s26 }
  0x5e   : > { %p1507_p2 = pnand %p1506_p0, %p1505_p12  ;;  %p1512_p10 = por %p1511_p6, %p1510_p13 }
  0x60   : > { %p1508_p1 = pneg %p1507_p2  ;;  %p1514_p7 = por %p1513_p3, %p1512_p10 }
  0x62   : > { %p1515_p9 = pnand %p1514_p7, %p1508_p1 }
  0x64   : > { %1518 = shalt.err (!%p1515_p9)
}
  0x65   : > { %s1519_s21 = scalar_lea.vmem %s1848_s17, 128  ;;  %s1648_s18 = smov [#allocation3]  }
  0x66   : > { %p1520_p12 = scmp.ne.s32.totalorder %s1848_s17, %s1519_s21  ;;  %s1524_s10 = sshll.u32 %s1648_s18, 4  ;;  %s1525_s10 = int_to_ptr.vmem [resolvable:$false] %s1524_s10 }
  0x67   : > { %s1526_s4 = scalar_lea.vmem %s1525_s10, 256  ;;  %p1527_p4 = scmp.lt.s32.totalorder %s1848_s17, %s1525_s10 }
  0x68   : > { %p1522_p2 = pnand %p1520_p12, %p1506_p0  ;;  %p1528_p13 = scmp.lt.s32.totalorder %s1526_s4, %s1519_s21 }
  0x6a   : > { %p1523_p5 = pneg %p1522_p2  ;;  %p1529_p6 = por %p1528_p13, %p1527_p4 }
  0x6c   : > { %p1530_p10 = pnand %p1529_p6, %p1523_p5 }
  0x6e   : > { %1533 = shalt.err (!%p1530_p10)
}
  0x6f   : > { %1361 = dma.hbm_to_vmem [thread:$0]  (!%p1850_p11), %s1846_s26, 128, %s1848_s17, %s289_s2  }
  0x70   : > { %s310_s14 = scalar_lea.vmem [#allocation6], %s1202_s16  ;;  %s1236_s15 = sshll.u32 %s1642_s30, 8 }
  0x71   : > { %s317_s25 = sshll.u32 %s310_s14, 4  ;;  %s1890_s10 = scalar_lea.hbm %s2091_s1, %s1236_s15  ;;  %s1884_s25 = int_to_ptr.vmem [resolvable:$true] %s317_s25 }
  0x72   : > { %s2116_s4 = sand.u32 1, %s1642_s30   ;;  %s1534_s23 = scalar_lea.hbm %s1890_s10, 256 }
  0x73   : > { %s1894_s0 = scalar_lea.sflag [#allocation7], %s2116_s4  ;;  %p1535_p4 = scmp.ne.s32.totalorder %s1890_s10, %s1534_s23 }
  0x74   : > { %s1539_s26 = scalar_lea.hbm %s2091_s1, 512  ;;  %p1540_p3 = scmp.lt.u32.totalorder %s1890_s10, %s2091_s1 }
  0x75   : > { %p1537_p5 = pnand %p1535_p4, %p1506_p0  ;;  %p1541_p7 = scmp.lt.u32.totalorder %s1539_s26, %s1534_s23 }
  0x76   : > { %p1543_p12 = scmp.lt.u32.totalorder %s1534_s23, %s1890_s10 }
  0x77   : > { %p1538_p1 = pneg %p1537_p5  ;;  %p1542_p9 = por %p1541_p7, %p1540_p3 }
  0x79   : > { %p1544_p2 = por %p1543_p12, %p1542_p9 }
  0x7b   : > { %p1545_p13 = pnand %p1544_p2, %p1538_p1 }
  0x7d   : > { %1548 = shalt.err (!%p1545_p13)
}
  0x7e   : > { %s1549_s14 = scalar_lea.vmem %s1884_s25, 256  ;;  %s1649_s15 = smov [#allocation6]  }
  0x7f   : > { %p1550_p6 = scmp.ne.s32.totalorder %s1884_s25, %s1549_s14  ;;  %s1554_s18 = sshll.u32 %s1649_s15, 4  ;;  %s1555_s18 = int_to_ptr.vmem [resolvable:$false] %s1554_s18 }
  0x80   : > { %s1556_s21 = scalar_lea.vmem %s1555_s18, 512  ;;  %p1557_p5 = scmp.lt.s32.totalorder %s1884_s25, %s1555_s18 }
  0x81   : > { %p1552_p10 = pnand %p1550_p6, %p1506_p0  ;;  %p1558_p3 = scmp.lt.s32.totalorder %s1556_s21, %s1549_s14 }
  0x83   : > { %p1553_p4 = pneg %p1552_p10  ;;  %p1559_p7 = por %p1558_p3, %p1557_p5 }
  0x85   : > { %p1560_p9 = pnand %p1559_p7, %p1553_p4 }
  0x87   : > { %1563 = shalt.err (!%p1560_p9)
}
  0x88   : > { %s1650_s23 = smov 128   ;;  %s1651_s4 = smov 8  }
  0x89   : > { %1364 = dma.hbm_to_vmem [thread:$0]  (!%p1850_p11), %s1890_s10, 256, %s1884_s25, %s1894_s0, %s1650_s23, %s1650_s23, %s1651_s4  }
  0x8a   : > { %329 = sbr.rel (%p1750_p8) target bundleno = 1633 (0x661), region = 52  ;;  %s1923_s2 = sand.u32 (!%p1750_p8), 1, %s1634_s28  }
  0x8b   : > { %s1206_s24 = sshll.u32 (!%p1750_p8), %s1923_s2, 3  ;;  %s332_s26 = scalar_lea.sflag (!%p1750_p8), [#allocation4], %s1923_s2 }
  0x8c   : > { %s335_s17 = scalar_lea.vmem (!%p1750_p8), [#allocation3], %s1206_s24  ;;  %p2117_p0 = scmp.ne.s32.totalorder (!%p1750_p8), %s2105_s11, 0 }
  0x91   : > { %1609 = dma.done.wait (%p2117_p0), %s332_s26, 128  }
  0x92   : > { %1611 = vsyncadd (%p2117_p0), %s332_s26, 4294967168  ;;  %s340_s0 = sand.u32 1, %s1731_s9   ;;  %s1207_s13 = sshll.u32 %s1923_s2, 4 }
  0x93   : > { %s341_s19 = scalar_lea.sflag [#allocation7], %s340_s0  ;;  %s344_s25 = scalar_lea.vmem [#allocation6], %s1207_s13 }
  0x94   : > { %1613 = dma.done.wait (%p2117_p0), %s341_s19, 256  }
  0x95   : > { %1615 = vsyncadd (%p2117_p0), %s341_s19, 4294967040  ;;  %p2118_p8 = scmp.eq.s32.totalorder %s1731_s9, 0 }
  0x97   : > { %1617 = dma.done.wait (%p2118_p8), [#allocation7], 256   ;;  %p2119_p11 = pmov %p2118_p8 }
  0x98   : > { %p2120_p1 = pmov %p2118_p8 }
  0x99   : > { %1619 = vsyncadd (%p2119_p11), [#allocation7], 4294967040 }
  0x9a   : > { %1621 = dma.done.wait (%p2120_p1), [#allocation10], 384   ;;  %p2121_p12 = pmov %p2120_p1 }
  0x9b   : > { %v1652_v0 = vmov 0.0   ;;  %vm1653_vm0 = vmmov 0   ;;  %v1425_v1 = vld [vmem:[#allocation9] sm:$0xff]   ;;  %v1426_v2 = vld [vmem:[#allocation9 + $0x8] sm:$0xff]   ;;  %v1427_v3 = vld [vmem:[#allocation8] sm:$0xff]   ;;  %vm419_vm1 = vcmask 261120  }
  0x9c   : > { %1623 = vsyncadd (%p2121_p12), [#allocation10], 4294966912  ;;  %1271 = vmatprep.subr.bf16.mxu1 %v1652_v0  ;;  %1263 = vmatprep.subr.bf16.mxu0 %v1652_v0  ;;  %v1428_v4 = vld [vmem:[#allocation9 + $0x10] sm:$0xff]   ;;  %v1429_v6 = vld [vmem:[#allocation8 + $0x8] sm:$0xff]   ;;  %vm495_vm2 = vcmask 392192   ;;  %vm543_vm3 = vcmask 64512  }
  0x9d   : > { %1277 = vmatprep.mubr.msk.bf16.mxu1 %vm1653_vm0, %v1652_v0  ;;  %1267 = vmatprep.mubr.msk.bf16.mxu0 %vm1653_vm0, %v1652_v0  ;;  %v393_v5 = vld [vmem:[%s344_s25] sm:$0xff]  ;;  %v392_v7 = vld [vmem:[%s335_s17] sm:$0xff]  ;;  %v1211_v11 = vld [vmem:[%s2093_s3] ss:$0 sm:$0xff]  ;;  %s1654_s15 = smov 112   ;;  %s1655_s18 = smov 120  }
  0x9e   : > { %1272 = vmatpush3.bf16.msra.mxu1 %v1425_v1  ;;  %1264 = vmatpush3.bf16.msra.mxu0 %v1427_v3  ;;  %v394_v8 = vld [vmem:[%s344_s25 + $0x8] sm:$0xff]  ;;  %v395_v9 = vpack.c.bf16 %v392_v7, %v392_v7  ;;  %s1656_s21 = smov 104   ;;  %vm590_vm4 = vcmask 130048   ;;  %s1657_s23 = smov 96   ;;  %vm766_vm5 = vcmask 130112   ;;  %vm881_vm6 = vcmask 195712  }
  0x9f   : > { %1273 = vmatprep.subr.bf16.mxu1 %v1652_v0  ;;  %1265 = vmatprep.subr.bf16.mxu0 %v1652_v0  ;;  %v463_v10 = vpack.c.bf16 %v394_v8, %v393_v5  ;;  %v1215_v15 = vld [vmem:[%s2095_s5] ss:$0 sm:$0xff]  ;;  %s1658_s4 = smov 80   ;;  %s1659_s26 = smov 72   ;;  %vm996_vm7 = vcmask 261312  }
  0xa0   : > { %s1660_s17 = smov 88   ;;  %s1661_s0 = smov 8  }
  0xa1   : > { %s1662_s10 = smov 16   ;;  %s1663_s16 = smov 24  }
  0xa2   : > { %1274 = vmatpush3.bf16.msra.mxu1 %v1426_v2  ;;  %1266 = vmatpush3.bf16.msra.mxu0 %v1429_v6  ;;  %p2122_p13 = scmp.ne.s32.totalorder %s2112_s22, 0 }
  0xa3   : > { %1275 = vmatprep.subr.bf16.mxu1 %v1652_v0  ;;  %1281 = vmatprep.subr.bf16.mxu0 %v1652_v0 }
  0xa5   : > { %1268 = vmatmul.mubr.msk.bf16.vlgmr.msra.gmra.mrb[0].mxu0 %vm419_vm1, %v395_v9 }
  0xa6   : > { %1276 = vmatpush3.bf16.msra.mxu1 %v1428_v4  ;;  %1283 = vmatprep.mubr.msk.bf16.mxu0 %vm1653_vm0, %v1652_v0 }
  0xa7   : > { %1287 = vmatprep.subr.bf16.mxu1 %v1652_v0 }
  0xa9   : > { %1278 = vmatmul.mubr.msk.bf16.vlgmr.msra.gmra.mrb[0].mxu1 %vm495_vm2, %v463_v10 }
  0xaa   : > { %1289 = vmatprep.mubr.msk.bf16.mxu1 %vm1653_vm0, %v1652_v0 }
 0x178   : > { %v457_v12 = vpop.f32.mrb[0].mxu0 }
 0x179   : > { %v1966_v13 = vadd.f32 %v1211_v11, %v457_v12  ;;  %v1269_v14 = vpop.f32.mrb[1].mxu0 }
 0x17a   : > { %v460_v17 = vpop.f32.mrb[2].mxu0 }
 0x17b   : > { %v1270_v19 = vpop.f32.mrb[3].mxu0  ;;  %v540_v24 = vmul.f32 0.35355338, %v1966_v13 }
 0x17c   : > { %v533_v16 = vpop.f32.mrb[0].mxu1 }
 0x17d   : > { %v1279_v18 = vpop.f32.mrb[1].mxu1  ;;  %v534_v21 = vadd.f32 %v1215_v15, %v533_v16  ;;  %v541_v27 = vpack.c.bf16 %v540_v24, %v540_v24 }
 0x17e   : > { %v536_v20 = vpop.f32.mrb[2].mxu1 }
 0x17f   : > { %v537_v22 = vadd.f32 %v1215_v15, %v536_v20  ;;  %v1280_v23 = vpop.f32.mrb[3].mxu1 }
 0x181   : > { %v1972_v25 = vpack.c.bf16 %v537_v22, %v534_v21 }
 0x183   : > { %770 = vrot.lane.b32.xlu1 %v1972_v25, %s1654_s15  ;;  %655 = vrot.lane.b32.xlu0 %v1972_v25, %s1655_s18  ;;  %v548_v26 = vsel %vm543_vm3, %v1972_v25, 0 }
 0x184   : > { %1282 = vmatpush3.bf16.xpose.msra.mxu0 %v548_v26 }
 0x185   : > { %1293 = vmatprep.subr.bf16.mxu0 %v1652_v0 }
 0x187   : > { %768 = vrot.lane.b32.xlu1 %v541_v27, %s1654_s15  ;;  %653 = vrot.lane.b32.xlu0 %v541_v27, %s1655_s18  ;;  %s1233_s18 = sshll.u32 %s1731_s9, 7 }
 0x18b   : > { %883 = vrot.lane.b32.xlu1 %v541_v27, %s1656_s21  ;;  %885 = vrot.lane.b32.xlu0 %v1972_v25, %s1656_s21  ;;  %s389_s21 = scalar_lea.vmem [#allocation11], %s1206_s24  ;;  %s1664_s24 = smov [#allocation11]  }
 0x18c   : > { %1284 = vmatmul.mubr.msk.bf16.vlgmr.msra.gmra.mrb[4].mxu0 %vm543_vm3, %v541_v27  ;;  %s1568_s13 = sshll.u32 %s1664_s24, 4  ;;  %s1569_s13 = int_to_ptr.vmem [resolvable:$false] %s1568_s13 }
 0x18d   : > { %1295 = vmatprep.mubr.msk.bf16.mxu0 %vm1653_vm0, %v1652_v0  ;;  %s1570_s19 = scalar_lea.vmem %s1569_s13, 256 }
 0x1f5   : > { %v656_v28 = vpop.permute.xlu0 %655  ;;  %v771_v30 = vpop.permute.xlu1 %770 }
 0x1f6   : > { %v661_v29 = vsel %vm543_vm3, %v656_v28, 0  ;;  %v776_v32 = vsel %vm543_vm3, %v771_v30, 0 }
 0x1f7   : > { %1294 = vmatpush3.bf16.xpose.msra.mxu0 %v661_v29 }
 0x1f8   : > { %1305 = vmatprep.subr.bf16.mxu0 %v1652_v0 }
 0x1f9   : > { %v654_v31 = vpop.permute.xlu0 %653  ;;  %v769_v34 = vpop.permute.xlu1 %768 }
 0x1fd   : > { %v886_v33 = vpop.permute.xlu0 %885  ;;  %v884_v36 = vpop.permute.xlu1 %883 }
 0x1fe   : > { %1296 = vmatmul.mubr.msk.bf16.vlgmr.msra.gmra.mrb[8].mxu0 %vm543_vm3, %v654_v31  ;;  %v891_v35 = vsel %vm543_vm3, %v886_v33, 0 }
 0x1ff   : > { %1306 = vmatpush3.bf16.xpose.msra.mxu0 %v776_v32  ;;  %1307 = vmatprep.mubr.msk.bf16.mxu0 %vm1653_vm0, %v1652_v0 }
 0x200   : > { %1317 = vmatprep.subr.bf16.mxu0 %v1652_v0 }
 0x206   : > { %1308 = vmatmul.mubr.msk.bf16.vlgmr.msra.gmra.mrb[12].mxu0 %vm543_vm3, %v769_v34 }
 0x207   : > { %1318 = vmatpush3.bf16.xpose.msra.mxu0 %v891_v35  ;;  %1319 = vmatprep.mubr.msk.bf16.mxu0 %vm1653_vm0, %v1652_v0 }
 0x208   : > { %1329 = vmatprep.subr.bf16.mxu0 %v1652_v0 }
 0x20e   : > { %1320 = vmatmul.mubr.msk.bf16.vlgmr.msra.gmra.mrb[16].mxu0 %vm543_vm3, %v884_v36 }
 0x20f   : > { %1333 = vmatprep.mubr.msk.bf16.mxu0 %vm1653_vm0, %v1652_v0 }
 0x25f   : > { %v584_v37 = vpop.f32.mrb[4].mxu0 }
 0x260   : > { %v1285_v38 = vpop.f32.mrb[5].mxu0  ;;  %v591_v39 = vsel %vm590_vm4, %v584_v37, -inf }
 0x261   : > { %592 = vmax.xlane.f32.xlu0 %v591_v39  ;;  %v587_v40 = vpop.f32.mrb[6].mxu0 }
 0x262   : > { %v1286_v41 = vpop.f32.mrb[7].mxu0 }
 0x2d1   : > { %v697_v42 = vpop.f32.mrb[8].mxu0 }
 0x2d2   : > { %v1297_v43 = vpop.f32.mrb[9].mxu0  ;;  %v703_v44 = vsel %vm590_vm4, %v697_v42, -inf }
 0x2d3   : > { %704 = vmax.xlane.f32.xlu1 %v703_v44  ;;  %v700_v45 = vpop.f32.mrb[10].mxu0  ;;  %v1430_v44 = vld [vmem:[%s2096_s6] sm:$0xff]  }
 0x2d4   : > { %v1298_v46 = vpop.f32.mrb[11].mxu0  ;;  %1330 = vmatpush3.bf16.msra.mxu0 %v1430_v44 }
 0x2d5   : > { %v1431_v46 = vld [vmem:[%s2096_s6 + $0x8] sm:$0xff]   ;;  %1331 = vmatprep.subr.bf16.mxu0 %v1652_v0 }
 0x2d8   : > { %1332 = vmatpush3.bf16.msra.mxu0 %v1431_v46 }
 0x2d9   : > { %v812_v47 = vpop.f32.mrb[12].mxu0 }
 0x2da   : > { %v1309_v48 = vpop.f32.mrb[13].mxu0  ;;  %v818_v49 = vsel %vm590_vm4, %v812_v47, -inf }
 0x2db   : > { %819 = vmax.xlane.f32.xlu0 %v818_v49  ;;  %v815_v50 = vpop.f32.mrb[14].mxu0 }
 0x2dc   : > { %v1310_v51 = vpop.f32.mrb[15].mxu0 }
 0x2e1   : > { %v927_v52 = vpop.f32.mrb[16].mxu0 }
 0x2e2   : > { %v1321_v53 = vpop.f32.mrb[17].mxu0  ;;  %v933_v54 = vsel %vm590_vm4, %v927_v52, -inf }
 0x2e3   : > { %934 = vmax.xlane.f32.xlu0 %v933_v54  ;;  %v930_v55 = vpop.f32.mrb[18].mxu0 }
 0x2e4   : > { %v1322_v56 = vpop.f32.mrb[19].mxu0 }
 0x2ee   : > { %v593_v57 = vpop.xlane.xlu0 %592 }
 0x2ef   : > { %v594_v58 = vsub.f32 %v584_v37, %v593_v57 }
 0x2f1   : > { %v595_v59 = vmul.f32 1.442695, %v594_v58 }
 0x2f3   : > { %1432 = vpow2.f32 %v595_v59 }
 0x2fd   : > { %v1433_v60 = vpop.eup %1432 }
 0x2fe   : > { %v597_v61 = vsel %vm590_vm4, %v1433_v60, 0.0 }
 0x2ff   : > { %598 = vadd.xlane.f32.xlu1 %v597_v61  ;;  %v1228_v61 = vld [vmem:[%s2097_s7] ss:$0 sm:$0xff] }
 0x310   : > { %604 = vrot.lane.b32.xlu1 %v1972_v25, %s1657_s23  ;;  %s1083_s23 = sshll.u32 %s389_s21, 4  ;;  %s2047_s23 = int_to_ptr.vmem [resolvable:$true] %s1083_s23 }
 0x311   : > { %s1564_s9 = scalar_lea.vmem %s2047_s23, 128  ;;  %p1571_p4 = scmp.lt.s32.totalorder %s2047_s23, %s1569_s13 }
 0x312   : > { %p1565_p2 = scmp.ne.s32.totalorder %s2047_s23, %s1564_s9  ;;  %p1572_p5 = scmp.lt.s32.totalorder %s1570_s19, %s1564_s9 }
 0x314   : > { %p1566_p6 = pnand %p1565_p2, %p2122_p13  ;;  %p1573_p3 = por %p1572_p5, %p1571_p4 }
 0x316   : > { %p1567_p10 = pneg %p1566_p6 }
 0x318   : > { %p1574_p7 = pnand %p1573_p3, %p1567_p10 }
 0x360   : > { %v705_v62 = vpop.xlane.xlu1 %704 }
 0x361   : > { %v706_v63 = vsub.f32 %v697_v42, %v705_v62 }
 0x363   : > { %v707_v1 = vmul.f32 1.442695, %v706_v63 }
 0x365   : > { %1434 = vpow2.f32 %v707_v1 }
 0x368   : > { %v820_v2 = vpop.xlane.xlu0 %819 }
 0x369   : > { %v821_v3 = vsub.f32 %v812_v47, %v820_v2 }
 0x36b   : > { %v822_v4 = vmul.f32 1.442695, %v821_v3 }
 0x36d   : > { %1436 = vpow2.f32 %v822_v4 }
 0x36f   : > { %v1435_v5 = vpop.eup %1434 }
 0x370   : > { %v935_v6 = vpop.xlane.xlu0 %934  ;;  %v709_v7 = vsel %vm590_vm4, %v1435_v5, 0.0 }
 0x371   : > { %v936_v8 = vsub.f32 %v927_v52, %v935_v6  ;;  %710 = vadd.xlane.f32.xlu0 %v709_v7 }
 0x373   : > { %v937_v9 = vmul.f32 1.442695, %v936_v8 }
 0x375   : > { %1438 = vpow2.f32 %v937_v9 }
 0x377   : > { %v1437_v10 = vpop.eup %1436 }
 0x378   : > { %v824_v11 = vsel %vm590_vm4, %v1437_v10, 0.0 }
 0x379   : > { %825 = vadd.xlane.f32.xlu1 %v824_v11 }
 0x37f   : > { %v1439_v12 = vpop.eup %1438 }
 0x380   : > { %v939_v14 = vsel %vm590_vm4, %v1439_v12, 0.0 }
 0x381   : > { %940 = vadd.xlane.f32.xlu0 %v939_v14 }
 0x38a   : > { %830 = vrot.lane.b32.xlu1 %v1972_v25, %s1658_s4 }
 0x38c   : > { %v599_v15 = vpop.xlane.xlu1 %598 }
 0x38d   : > { %1440 = vrcp.f32 %v599_v15 }
 0x38e   : > { %945 = vrot.lane.b32.xlu1 %v1972_v25, %s1659_s26 }
 0x390   : > { %v605_v16 = vpop.permute.xlu1 %604 }
 0x391   : > { %1288 = vmatpush3.bf16.msra.mxu1 %v605_v16 }
 0x392   : > { %1299 = vmatprep.subr.bf16.mxu1 %v1652_v0 }
 0x397   : > { %v1441_v17 = vpop.eup %1440  ;;  %715 = vrot.lane.b32.xlu0 %v1972_v25, %s1660_s17  ;;  %s2045_s17 = scalar_lea.hbm %s2098_s8, %s1233_s18 }
 0x398   : > { %v601_v18 = vmul.f32 %v1441_v17, %v1433_v60 }
 0x39a   : > { %v602_v19 = vpack.c.bf16 %v601_v18, %v601_v18 }
 0x39c   : > { %1290 = vmatmul.mubr.msk.bf16.vlgmr.msra.gmra.mrb[4].mxu1 %vm590_vm4, %v602_v19 }
 0x39d   : > { %1301 = vmatprep.mubr.msk.bf16.mxu1 %vm1653_vm0, %v1652_v0 }
 0x3fe   : > { %v711_v20 = vpop.xlane.xlu0 %710 }
 0x3ff   : > { %1442 = vrcp.f32 %v711_v20 }
 0x406   : > { %v826_v21 = vpop.xlane.xlu1 %825 }
 0x407   : > { %1444 = vrcp.f32 %v826_v21 }
 0x409   : > { %v1443_v22 = vpop.eup %1442 }
 0x40a   : > { %v713_v24 = vmul.f32 %v1443_v22, %v1435_v5  ;;  %v831_v28 = vpop.permute.xlu1 %830 }
 0x40c   : > { %v714_v27 = vpack.c.bf16 %v713_v24, %v713_v24 }
 0x40e   : > { %v941_v23 = vpop.xlane.xlu0 %940  ;;  %v946_v32 = vpop.permute.xlu1 %945 }
 0x40f   : > { %1446 = vrcp.f32 %v941_v23 }
 0x411   : > { %v1445_v25 = vpop.eup %1444 }
 0x412   : > { %v716_v26 = vpop.permute.xlu0 %715  ;;  %v828_v29 = vmul.f32 %v1445_v25, %v1437_v10 }
 0x413   : > { %1300 = vmatpush3.bf16.msra.mxu1 %v716_v26 }
 0x414   : > { %1311 = vmatprep.subr.bf16.mxu1 %v1652_v0  ;;  %v829_v30 = vpack.c.bf16 %v828_v29, %v828_v29 }
 0x416   : > { %1302 = vmatmul.mubr.msk.bf16.vlgmr.msra.gmra.mrb[8].mxu1 %vm590_vm4, %v714_v27 }
 0x417   : > { %1312 = vmatpush3.bf16.msra.mxu1 %v831_v28  ;;  %1313 = vmatprep.mubr.msk.bf16.mxu1 %vm1653_vm0, %v1652_v0 }
 0x418   : > { %1323 = vmatprep.subr.bf16.mxu1 %v1652_v0 }
 0x419   : > { %v1447_v31 = vpop.eup %1446 }
 0x41a   : > { %v943_v33 = vmul.f32 %v1447_v31, %v1439_v12 }
 0x41c   : > { %v944_v34 = vpack.c.bf16 %v943_v33, %v943_v33 }
 0x41e   : > { %1314 = vmatmul.mubr.msk.bf16.vlgmr.msra.gmra.mrb[12].mxu1 %vm590_vm4, %v829_v30 }
 0x41f   : > { %1324 = vmatpush3.bf16.msra.mxu1 %v946_v32  ;;  %1325 = vmatprep.mubr.msk.bf16.mxu1 %vm1653_vm0, %v1652_v0 }
 0x426   : > { %1326 = vmatmul.mubr.msk.bf16.vlgmr.msra.gmra.mrb[16].mxu1 %vm590_vm4, %v944_v34 }
 0x46f   : > { %v644_v35 = vpop.f32.mrb[4].mxu1 }
 0x470   : > { %v650_v36 = vadd.f32 %v644_v35, %v1966_v13  ;;  %v1291_v37 = vpop.f32.mrb[5].mxu1 }
 0x471   : > { %v647_v38 = vpop.f32.mrb[6].mxu1 }
 0x472   : > { %651 = vst.msk [vmem:[#allocation2] sm:$0xff] %vm543_vm3, %v650_v36  ;;  %v1292_v39 = vpop.f32.mrb[7].mxu1 }
 0x4e9   : > { %v755_v40 = vpop.f32.mrb[8].mxu1 }
 0x4ea   : > { %762 = vrot.lane.b32.xlu0 %v755_v40, %s1661_s0  ;;  %v1303_v41 = vpop.f32.mrb[9].mxu1  ;;  %s1070_s0 = scalar_lea.sflag [#allocation5], %s1923_s2 }
 0x4eb   : > { %v758_v42 = vpop.f32.mrb[10].mxu1 }
 0x4ec   : > { %v1304_v43 = vpop.f32.mrb[11].mxu1 }
 0x4f1   : > { %v870_v45 = vpop.f32.mrb[12].mxu1 }
 0x4f2   : > { %877 = vrot.lane.b32.xlu1 %v870_v45, %s1662_s10  ;;  %v1315_v47 = vpop.f32.mrb[13].mxu1 }
 0x4f3   : > { %v873_v48 = vpop.f32.mrb[14].mxu1 }
 0x4f4   : > { %v1316_v49 = vpop.f32.mrb[15].mxu1 }
 0x4f9   : > { %v985_v50 = vpop.f32.mrb[16].mxu1 }
 0x4fa   : > { %992 = vrot.lane.b32.xlu0 %v985_v50, %s1663_s16  ;;  %v1327_v51 = vpop.f32.mrb[17].mxu1 }
 0x4fb   : > { %v988_v52 = vpop.f32.mrb[18].mxu1 }
 0x4fc   : > { %v1328_v53 = vpop.f32.mrb[19].mxu1 }
 0x55c   : > { %v763_v54 = vpop.permute.xlu0 %762 }
 0x55d   : > { %v765_v55 = vadd.f32 %v763_v54, %v1966_v13 }
 0x55f   : > { %767 = vst.msk [vmem:[#allocation2] sm:$0xff] %vm766_vm5, %v765_v55 }
 0x564   : > { %v878_v56 = vpop.permute.xlu1 %877 }
 0x565   : > { %v880_v0 = vadd.f32 %v878_v56, %v1966_v13 }
 0x567   : > { %882 = vst.msk [vmem:[#allocation2] sm:$0xff] %vm881_vm6, %v880_v0 }
 0x56c   : > { %v993_v57 = vpop.permute.xlu0 %992 }
 0x56d   : > { %v995_v58 = vadd.f32 %v993_v57, %v1966_v13 }
 0x56f   : > { %997 = vst.msk [vmem:[#allocation2] sm:$0xff] %vm996_vm7, %v995_v58 }
 0x576   : > { %v998_v59 = vld [vmem:[#allocation2] sm:$0xff] }
 0x577   : > { %v999_v60 = vpack.c.bf16 %v998_v59, %v998_v59 }
 0x579   : > { %1334 = vmatmul.mubr.msk.bf16.vlgmr.msra.gmra.mrb[20].mxu0 %vm419_vm1, %v999_v60 }
 0x64c   : > { %v1060_v62 = vpop.f32.mrb[20].mxu0 }
 0x64d   : > { %v1061_v63 = vadd.f32 %v1228_v61, %v1060_v62  ;;  %v1335_v1 = vpop.f32.mrb[21].mxu0 }
 0x64e   : > { %v1063_v2 = vpop.f32.mrb[22].mxu0 }
 0x64f   : > { %v1066_v13 = vmax.f32 %v1061_v63, 0.0  ;;  %v1336_v3 = vpop.f32.mrb[23].mxu0 }
 0x651   : > { %v1067_v4 = vadd.f32 %v1066_v13, %v998_v59 }
 0x653   : > { %1068 = vst.msk [vmem:[%s389_s21] sm:$0xff] %vm419_vm1, %v1067_v4 }
 0x654   : > { %1577 = shalt.err (!%p1574_p7)
}
 0x655   : > { %s1578_s2 = scalar_lea.hbm %s2045_s17, 128  ;;  %s1582_s10 = scalar_lea.hbm %s2098_s8, 256 }
 0x656   : > { %p1579_p9 = scmp.ne.s32.totalorder %s2045_s17, %s1578_s2  ;;  %p1583_p11 = scmp.lt.u32.totalorder %s2045_s17, %s2098_s8 }
 0x657   : > { %p1584_p1 = scmp.lt.u32.totalorder %s1582_s10, %s1578_s2  ;;  %p1586_p2 = scmp.lt.u32.totalorder %s1578_s2, %s2045_s17 }
 0x658   : > { %p1580_p0 = pnand %p1579_p9, %p2122_p13 }
 0x659   : > { %p1585_p12 = por %p1584_p1, %p1583_p11 }
 0x65a   : > { %p1581_p8 = pneg %p1580_p0 }
 0x65b   : > { %p1587_p6 = por %p1586_p2, %p1585_p12 }
 0x65d   : > { %p1588_p10 = pnand %p1587_p6, %p1581_p8 }
 0x65f   : > { %1591 = shalt.err (!%p1588_p10)
}
 0x660   : > { %1349 = dma.vmem_to_hbm [thread:$0]  (%p2122_p13), %s2047_s23, 128, %s2045_s17, %s1070_s0  }
 0x661 PF: > { %s1095_s15 = sand.u32 1, %s1630_s27   ;;  %p2123_p4 = scmp.ne.s32.totalorder %s2106_s12, 0 }
 0x662   : > { %p2124_p5 = scmp.ge.s32.totalorder %s1642_s30, 2  ;;  %s1096_s18 = scalar_lea.sflag [#allocation5], %s1095_s15 }
 0x664   : > { %p1366_p3 = pnand %p2124_p5, %p2123_p4 }
 0x666   : > { %1625 = dma.done.wait (!%p1366_p3), %s1096_s18, 128  }
 0x667   : > { %1627 = vsyncadd (!%p1366_p3), %s1096_s18, 4294967168  ;;  %s2125_s21 = sld [smem:[#allocation17_spill]]  ;;  %p25_p7 = scmp.ge.s32.totalorder %s1820_s20, 4  }
 0x668   : > { %s2126_s27 = smov %s1634_s28  ;;  %s2127_s28 = smov %s1638_s29 }
 0x669   : > { %s2129_s30 = smov %s1820_s20  ;;  %27 = sbr.rel (!%p25_p7) target bundleno = 12 (0xc), region = 118 }
 0x66d   : > { %s2128_s29 = smov %s2125_s21 }
 0x670   :  { %1101 = vsyncpa [#allocation4], 1 }
 0x671   :  { %1103 = vsyncpa [#allocation4 + $0x1], 1 }
 0x672   :  { %1104 = vsyncpa [#allocation7], 1 }
 0x673   :  { %1106 = vsyncpa [#allocation7 + $0x1], 1 }
 0x674   :  { %1107 = vsyncpa [#allocation10], 1 }
 0x675   :  { %1108 = vsyncpa [#allocation5], 1 }
 0x676   :  { %1110 = vsyncpa [#allocation5 + $0x1], 1 }

</bundles_post_ra>
